<compile_context>
chip_gen: v6e
topology: v6e:2x2x1
jax: 0.10.0
libtpu: 0.0.40
codegen_flags: <defaults>
</compile_context>

<pallas_src>
import functools

import jax
import jax.numpy as jnp
from jax.experimental import pallas as pl
from jax.experimental.pallas import tpu as pltpu


def rnn_decoder_kernel(x_ref, h0_ref, wih_t_ref, whh_t_ref, bias_ref,
                       wdec_t_ref, bdec_ref, decoded_ref, hidden_ref):
    """Single-shot kernel (whole problem VMEM-resident; shapes are tiny).

    x_ref:      (T*BP, I)  time-major input, flattened over (T, BP)
    h0_ref:     (BP, H)
    wih_t_ref:  (I, H)     == W_ih.T
    whh_t_ref:  (H, H)     == W_hh.T
    bias_ref:   (1, H)     == b_ih + b_hh (pre-summed in the wrapper)
    wdec_t_ref: (H, OP)    == W_dec.T zero-padded to OP lanes
    bdec_ref:   (1, OP)    == b_dec zero-padded
    decoded_ref:(T*BP, OP) lane-dense output (wrapper slices to (T, B, O))
    hidden_ref: (BP, H)    final hidden state (wrapper slices to (1, B, H))
    """
    TB, _ = x_ref.shape
    BP, _ = h0_ref.shape
    T = TB // BP

    # --- Hoisted input projection: one batched matmul for all timesteps. ---
    x_proj = (jnp.dot(x_ref[...], wih_t_ref[...],
                      preferred_element_type=jnp.float32)
              + bias_ref[...])                                 # (T*BP, H)
    whh_t = whh_t_ref[...]

    # --- Sequential recurrence: only h @ Whh^T is serial. T static -> unrolled.
    #     Hidden states stay vreg-resident (no VMEM scratch round trip). ---
    # TODO(synk): for much larger H, keep Whh weight-stationary on the MXU via
    # pltpu.matmul_push_rhs / matmul_acc_lhs / matmul_pop instead of jnp.dot.
    h = h0_ref[...]
    hs = []
    for t in range(T):
        pre = x_proj[t * BP:(t + 1) * BP, :] + jnp.dot(
            h, whh_t, preferred_element_type=jnp.float32)
        h = jnp.maximum(pre, 0.0)                              # relu nonlinearity
        hs.append(h)
    hidden_ref[...] = h

    # --- Hoisted decoder: one batched matmul + single lane-dense bulk store. ---
    h_all = jnp.concatenate(hs, axis=0)                        # (T*BP, H)
    decoded_ref[...] = (jnp.dot(h_all, wdec_t_ref[...],
                                preferred_element_type=jnp.float32)
                        + bdec_ref[...])


def prepare_params(w_ih, w_hh, b_ih, b_hh, w_dec, b_dec):
    """One-time weight prep (transpose / cast / pad) hoisted off the per-call path."""
    H = w_ih.shape[0]
    O = w_dec.shape[0]
    OP = max(128, ((O + 127) // 128) * 128)                    # lane-dense decoder output
    wih_t = jnp.asarray(w_ih.T, jnp.float32)                   # (I, H)
    whh_t = jnp.asarray(w_hh.T, jnp.float32)                   # (H, H)
    bias = jnp.asarray(b_ih + b_hh, jnp.float32).reshape(1, H)
    wdec_t = jnp.zeros((H, OP), jnp.float32).at[:, :O].set(
        jnp.asarray(w_dec.T, jnp.float32))
    bdec = jnp.zeros((1, OP), jnp.float32).at[:, :O].set(
        jnp.asarray(b_dec, jnp.float32))
    return (wih_t, whh_t, bias, wdec_t, bdec)


@functools.partial(jax.jit, static_argnames=("num_outputs",))
def rnn_model_forward(x, h0, params, *, num_outputs):
    """Pallas equivalent of RNNModel.forward(x, h0) -> (decoded, hidden)."""
    wih_t, whh_t, bias, wdec_t, bdec = params
    T, B, I = x.shape
    H = whh_t.shape[0]
    OP = wdec_t.shape[1]
    BP = max(8, ((B + 7) // 8) * 8)                            # sublane-aligned batch

    # Zero-pad batch so each timestep is an aligned 8xlane slab inside the kernel.
    # (Padded rows evolve as relu(bias + ...) but never touch the real rows; they
    #  are sliced off below.)
    x_p = jnp.zeros((T, BP, I), jnp.float32).at[:, :B, :].set(x.astype(jnp.float32))
    h0_p = jnp.zeros((BP, H), jnp.float32).at[:B, :].set(h0[0].astype(jnp.float32))

    vmem = pl.BlockSpec(memory_space=pltpu.MemorySpace.VMEM)
    flops = 2 * T * BP * H * (I + H) + 2 * T * BP * H * OP + 3 * T * BP * H
    bytes_accessed = 4 * (T * BP * I + BP * H + I * H + H * H + H
                          + H * OP + OP + T * BP * OP + BP * H)

    # TODO(synk): if T*B grows large, chunk T with an "arbitrary" grid axis carrying h
    # in a persistent VMEM scratch (v7x has only 64 MiB VMEM), and add a parallel
    # batch grid axis to use both v7x TensorCores.
    decoded_pad, hidden_pad = pl.pallas_call(
        rnn_decoder_kernel,
        out_shape=(
            jax.ShapeDtypeStruct((T * BP, OP), jnp.float32),
            jax.ShapeDtypeStruct((BP, H), jnp.float32),
        ),
        in_specs=[vmem] * 7,
        out_specs=(vmem, vmem),
        cost_estimate=pl.CostEstimate(flops=flops, transcendentals=0,
                                      bytes_accessed=bytes_accessed),
    )(
        x_p.reshape(T * BP, I),
        h0_p,
        wih_t, whh_t, bias, wdec_t, bdec,
    )

    decoded = decoded_pad.reshape(T, BP, OP)[:, :B, :num_outputs]
    hidden = hidden_pad[:B][None]      # PyTorch leading num_layers dim (=1)
    return decoded, hidden


def rnn_model_reference(x, h0, w_ih, w_hh, b_ih, b_hh, w_dec, b_dec):
    """Pure-JAX reference mirroring torch.nn.RNN(relu) + nn.Linear."""
    h = h0[0]
    outs = []
    for t in range(x.shape[0]):
        h = jnp.maximum(x[t] @ w_ih.T + b_ih + h @ w_hh.T + b_hh, 0.0)
        outs.append(h @ w_dec.T + b_dec)
    return jnp.stack(outs), h[None]


def init_params(key, num_inputs, num_hidden, num_outputs):
    """Deterministic param init matching PyTorch shapes/distributions."""
    k = jax.random.split(key, 6)
    s = 1.0 / jnp.sqrt(num_hidden)
    w_ih = jax.random.uniform(k[0], (num_hidden, num_inputs), jnp.float32, -s, s)
    w_hh = jax.random.uniform(k[1], (num_hidden, num_hidden), jnp.float32, -s, s)
    b_ih = jax.random.uniform(k[2], (num_hidden,), jnp.float32, -s, s)
    b_hh = jax.random.uniform(k[3], (num_hidden,), jnp.float32, -s, s)
    w_dec = jax.random.uniform(k[4], (num_outputs, num_hidden), jnp.float32, -s, s)
    b_dec = jax.random.uniform(k[5], (num_outputs,), jnp.float32, -s, s)
    return w_ih, w_hh, b_ih, b_hh, w_dec, b_dec


if __name__ == "__main__":
    # Small shapes implied by the module: seq=8, batch=2, num_inputs=4,
    # num_hidden=32, num_layers=1, num_outputs=2.
    T, B, I, H, O = 8, 2, 4, 32, 2

    key = jax.random.PRNGKey(0)
    k_x, k_h, k_p = jax.random.split(key, 3)

    x = jax.random.normal(k_x, (T, B, I), jnp.float32)         # (seq, batch, input)
    h0 = jax.random.normal(k_h, (1, B, H), jnp.float32)        # (num_layers, batch, hidden)
    w_ih, w_hh, b_ih, b_hh, w_dec, b_dec = init_params(k_p, I, H, O)

    params = prepare_params(w_ih, w_hh, b_ih, b_hh, w_dec, b_dec)  # one-time prep

    decoded, hidden = rnn_model_forward(x, h0, params, num_outputs=O)
    jax.block_until_ready((decoded, hidden))

    ref_decoded, ref_hidden = rnn_model_reference(
        x, h0, w_ih, w_hh, b_ih, b_hh, w_dec, b_dec)

    assert decoded.shape == (T, B, O), decoded.shape
    assert hidden.shape == (1, B, H), hidden.shape
    assert jnp.allclose(decoded, ref_decoded, atol=1e-5, rtol=1e-5)
    assert jnp.allclose(hidden, ref_hidden, atol=1e-5, rtol=1e-5)

    print("KERNEL_OK")
</pallas_src>

<mosaic_0001>
module attributes {stable_mosaic.version = 11 : i64} {
  func.func @rnn_decoder_kernel(%arg0: memref<64x4xf32, #tpu.memory_space<vmem>>, %arg1: memref<8x32xf32, #tpu.memory_space<vmem>>, %arg2: memref<4x32xf32, #tpu.memory_space<vmem>>, %arg3: memref<32x32xf32, #tpu.memory_space<vmem>>, %arg4: memref<1x32xf32, #tpu.memory_space<vmem>>, %arg5: memref<32x128xf32, #tpu.memory_space<vmem>>, %arg6: memref<1x128xf32, #tpu.memory_space<vmem>>, %arg7: memref<64x128xf32, #tpu.memory_space<vmem>>, %arg8: memref<8x32xf32, #tpu.memory_space<vmem>>) attributes {dimension_semantics = [], scalar_prefetch = 0 : i64, scratch_operands = 0 : i64, tpu.core_type = #tpu.core_type<tc>} {
    %c0 = arith.constant 0 : index
    %c0_0 = arith.constant 0 : index
    %0 = vector.load %arg0[%c0, %c0_0] : memref<64x4xf32, #tpu.memory_space<vmem>>, vector<64x4xf32>
    %c0_1 = arith.constant 0 : index
    %c0_2 = arith.constant 0 : index
    %1 = vector.load %arg2[%c0_1, %c0_2] : memref<4x32xf32, #tpu.memory_space<vmem>>, vector<4x32xf32>
    %cst = arith.constant dense<0.000000e+00> : vector<64x32xf32>
    %2 = tpu.matmul %0, %1, %cst {dimension_numbers = #tpu.dot_dimension_numbers<[1], [0], [0], [1], [0, 0, 1, 1], [], []>} : vector<64x4xf32>, vector<4x32xf32>, vector<64x32xf32> -> vector<64x32xf32>
    %c0_3 = arith.constant 0 : index
    %c0_4 = arith.constant 0 : index
    %3 = vector.load %arg4[%c0_3, %c0_4] : memref<1x32xf32, #tpu.memory_space<vmem>>, vector<1x32xf32>
    %4 = vector.broadcast %3 : vector<1x32xf32> to vector<64x32xf32>
    %5 = arith.addf %2, %4 : vector<64x32xf32>
    %c0_5 = arith.constant 0 : index
    %c0_6 = arith.constant 0 : index
    %6 = vector.load %arg3[%c0_5, %c0_6] : memref<32x32xf32, #tpu.memory_space<vmem>>, vector<32x32xf32>
    %c0_7 = arith.constant 0 : index
    %c0_8 = arith.constant 0 : index
    %7 = vector.load %arg1[%c0_7, %c0_8] : memref<8x32xf32, #tpu.memory_space<vmem>>, vector<8x32xf32>
    %8 = vector.extract_strided_slice %5 {offsets = [0, 0], sizes = [8, 32], strides = [1, 1]} : vector<64x32xf32> to vector<8x32xf32>
    %cst_9 = arith.constant dense<0.000000e+00> : vector<8x32xf32>
    %9 = tpu.matmul %7, %6, %cst_9 {dimension_numbers = #tpu.dot_dimension_numbers<[1], [0], [0], [1], [0, 0, 1, 1], [], []>} : vector<8x32xf32>, vector<32x32xf32>, vector<8x32xf32> -> vector<8x32xf32>
    %10 = arith.addf %8, %9 : vector<8x32xf32>
    %cst_10 = arith.constant 0.000000e+00 : f32
    %11 = vector.broadcast %cst_10 : f32 to vector<8x32xf32>
    %12 = arith.maximumf %10, %11 : vector<8x32xf32>
    %13 = vector.extract_strided_slice %5 {offsets = [8, 0], sizes = [8, 32], strides = [1, 1]} : vector<64x32xf32> to vector<8x32xf32>
    %cst_11 = arith.constant dense<0.000000e+00> : vector<8x32xf32>
    %14 = tpu.matmul %12, %6, %cst_11 {dimension_numbers = #tpu.dot_dimension_numbers<[1], [0], [0], [1], [0, 0, 1, 1], [], []>} : vector<8x32xf32>, vector<32x32xf32>, vector<8x32xf32> -> vector<8x32xf32>
    %15 = arith.addf %13, %14 : vector<8x32xf32>
    %cst_12 = arith.constant 0.000000e+00 : f32
    %16 = vector.broadcast %cst_12 : f32 to vector<8x32xf32>
    %17 = arith.maximumf %15, %16 : vector<8x32xf32>
    %18 = vector.extract_strided_slice %5 {offsets = [16, 0], sizes = [8, 32], strides = [1, 1]} : vector<64x32xf32> to vector<8x32xf32>
    %cst_13 = arith.constant dense<0.000000e+00> : vector<8x32xf32>
    %19 = tpu.matmul %17, %6, %cst_13 {dimension_numbers = #tpu.dot_dimension_numbers<[1], [0], [0], [1], [0, 0, 1, 1], [], []>} : vector<8x32xf32>, vector<32x32xf32>, vector<8x32xf32> -> vector<8x32xf32>
    %20 = arith.addf %18, %19 : vector<8x32xf32>
    %cst_14 = arith.constant 0.000000e+00 : f32
    %21 = vector.broadcast %cst_14 : f32 to vector<8x32xf32>
    %22 = arith.maximumf %20, %21 : vector<8x32xf32>
    %23 = vector.extract_strided_slice %5 {offsets = [24, 0], sizes = [8, 32], strides = [1, 1]} : vector<64x32xf32> to vector<8x32xf32>
    %cst_15 = arith.constant dense<0.000000e+00> : vector<8x32xf32>
    %24 = tpu.matmul %22, %6, %cst_15 {dimension_numbers = #tpu.dot_dimension_numbers<[1], [0], [0], [1], [0, 0, 1, 1], [], []>} : vector<8x32xf32>, vector<32x32xf32>, vector<8x32xf32> -> vector<8x32xf32>
    %25 = arith.addf %23, %24 : vector<8x32xf32>
    %cst_16 = arith.constant 0.000000e+00 : f32
    %26 = vector.broadcast %cst_16 : f32 to vector<8x32xf32>
    %27 = arith.maximumf %25, %26 : vector<8x32xf32>
    %28 = vector.extract_strided_slice %5 {offsets = [32, 0], sizes = [8, 32], strides = [1, 1]} : vector<64x32xf32> to vector<8x32xf32>
    %cst_17 = arith.constant dense<0.000000e+00> : vector<8x32xf32>
    %29 = tpu.matmul %27, %6, %cst_17 {dimension_numbers = #tpu.dot_dimension_numbers<[1], [0], [0], [1], [0, 0, 1, 1], [], []>} : vector<8x32xf32>, vector<32x32xf32>, vector<8x32xf32> -> vector<8x32xf32>
    %30 = arith.addf %28, %29 : vector<8x32xf32>
    %cst_18 = arith.constant 0.000000e+00 : f32
    %31 = vector.broadcast %cst_18 : f32 to vector<8x32xf32>
    %32 = arith.maximumf %30, %31 : vector<8x32xf32>
    %33 = vector.extract_strided_slice %5 {offsets = [40, 0], sizes = [8, 32], strides = [1, 1]} : vector<64x32xf32> to vector<8x32xf32>
    %cst_19 = arith.constant dense<0.000000e+00> : vector<8x32xf32>
    %34 = tpu.matmul %32, %6, %cst_19 {dimension_numbers = #tpu.dot_dimension_numbers<[1], [0], [0], [1], [0, 0, 1, 1], [], []>} : vector<8x32xf32>, vector<32x32xf32>, vector<8x32xf32> -> vector<8x32xf32>
    %35 = arith.addf %33, %34 : vector<8x32xf32>
    %cst_20 = arith.constant 0.000000e+00 : f32
    %36 = vector.broadcast %cst_20 : f32 to vector<8x32xf32>
    %37 = arith.maximumf %35, %36 : vector<8x32xf32>
    %38 = vector.extract_strided_slice %5 {offsets = [48, 0], sizes = [8, 32], strides = [1, 1]} : vector<64x32xf32> to vector<8x32xf32>
    %cst_21 = arith.constant dense<0.000000e+00> : vector<8x32xf32>
    %39 = tpu.matmul %37, %6, %cst_21 {dimension_numbers = #tpu.dot_dimension_numbers<[1], [0], [0], [1], [0, 0, 1, 1], [], []>} : vector<8x32xf32>, vector<32x32xf32>, vector<8x32xf32> -> vector<8x32xf32>
    %40 = arith.addf %38, %39 : vector<8x32xf32>
    %cst_22 = arith.constant 0.000000e+00 : f32
    %41 = vector.broadcast %cst_22 : f32 to vector<8x32xf32>
    %42 = arith.maximumf %40, %41 : vector<8x32xf32>
    %43 = vector.extract_strided_slice %5 {offsets = [56, 0], sizes = [8, 32], strides = [1, 1]} : vector<64x32xf32> to vector<8x32xf32>
    %cst_23 = arith.constant dense<0.000000e+00> : vector<8x32xf32>
    %44 = tpu.matmul %42, %6, %cst_23 {dimension_numbers = #tpu.dot_dimension_numbers<[1], [0], [0], [1], [0, 0, 1, 1], [], []>} : vector<8x32xf32>, vector<32x32xf32>, vector<8x32xf32> -> vector<8x32xf32>
    %45 = arith.addf %43, %44 : vector<8x32xf32>
    %cst_24 = arith.constant 0.000000e+00 : f32
    %46 = vector.broadcast %cst_24 : f32 to vector<8x32xf32>
    %47 = arith.maximumf %45, %46 : vector<8x32xf32>
    %c0_25 = arith.constant 0 : index
    %c0_26 = arith.constant 0 : index
    %48 = vector.load %arg8[%c0_25, %c0_26] : memref<8x32xf32, #tpu.memory_space<vmem>>, vector<8x32xf32>
    tpu.vector_store %arg8[%c0_25, %c0_26], %47 {strides = array<i32>} : memref<8x32xf32, #tpu.memory_space<vmem>>, vector<8x32xf32>,
    %49 = tpu.concatenate %12, %17, %22, %27, %32, %37, %42, %47 in 0 : vector<8x32xf32>, vector<8x32xf32>, vector<8x32xf32>, vector<8x32xf32>, vector<8x32xf32>, vector<8x32xf32>, vector<8x32xf32>, vector<8x32xf32> -> vector<64x32xf32>
    %c0_27 = arith.constant 0 : index
    %c0_28 = arith.constant 0 : index
    %50 = vector.load %arg5[%c0_27, %c0_28] : memref<32x128xf32, #tpu.memory_space<vmem>>, vector<32x128xf32>
    %cst_29 = arith.constant dense<0.000000e+00> : vector<64x128xf32>
    %51 = tpu.matmul %49, %50, %cst_29 {dimension_numbers = #tpu.dot_dimension_numbers<[1], [0], [0], [1], [0, 0, 1, 1], [], []>} : vector<64x32xf32>, vector<32x128xf32>, vector<64x128xf32> -> vector<64x128xf32>
    %c0_30 = arith.constant 0 : index
    %c0_31 = arith.constant 0 : index
    %52 = vector.load %arg6[%c0_30, %c0_31] : memref<1x128xf32, #tpu.memory_space<vmem>>, vector<1x128xf32>
    %53 = vector.broadcast %52 : vector<1x128xf32> to vector<64x128xf32>
    %54 = arith.addf %51, %53 : vector<64x128xf32>
    %c0_32 = arith.constant 0 : index
    %c0_33 = arith.constant 0 : index
    %55 = vector.load %arg7[%c0_32, %c0_33] : memref<64x128xf32, #tpu.memory_space<vmem>>, vector<64x128xf32>
    tpu.vector_store %arg7[%c0_32, %c0_33], %54 {strides = array<i32>} : memref<64x128xf32, #tpu.memory_space<vmem>>, vector<64x128xf32>,
    return
  }
}

</mosaic_0001>

<bundles_post_ra>
// kernel: rnn_model_forward.1
= control target key start
LH: loop header
LB: loop body
LE: loop exit
PB: predicated region body
PF: predicated region fallthrough
CT: control target
= control target key end

     0   :  { %vm69_vm0 = vcmask 1043456   ;;  %vm44_vm1 = vcmask 31744   ;;  %v1134_v5 = vmov 0.0   ;;  %vm1135_vm2 = vmmov 0   ;;  %s1424_s2 = inlined_call_operand.vmem [shape: f32[4,32], index: 2, kind: input, shape index: {}]   ;;  %s1425_s0 = inlined_call_operand.vmem [shape: f32[64,4], index: 0, kind: input, shape index: {}]   ;;  %s1426_s3 = inlined_call_operand.vmem [shape: f32[32,32], index: 3, kind: input, shape index: {}]   ;;  %s1427_s1 = inlined_call_operand.vmem [shape: f32[8,32], index: 1, kind: input, shape index: {}]   ;;  %s1428_s4 = inlined_call_operand.vmem [shape: f32[1,32], index: 4, kind: input, shape index: {}]   ;;  %s1429_s5 = inlined_call_operand.vmem [shape: f32[32,128], index: 5, kind: input, shape index: {}]   ;;  %s1430_s6 = inlined_call_operand.vmem [shape: f32[1,128], index: 6, kind: input, shape index: {}]   ;;  %s1431_s7 = inlined_call_operand.vmem [shape: f32[64,128], index: 7, kind: output, shape index: {0}]   ;;  %s1432_s8 = inlined_call_operand.vmem [shape: f32[8,32], index: 8, kind: output, shape index: {1}]  }
   0x1   :  { %v36_v0 = vld [vmem:[%s1424_s2] sm:$0xf]  ;;  %v33_v2 = vld [vmem:[%s1425_s0 + $0x28] sm:$0xff]  ;;  %v1195_v3 = vld [vmem:[%s1426_s3 + $0x18] sm:$0xff]  ;;  %vm183_vm3 = vcmask 261120  }
   0x2   :  { %v32_v1 = vld [vmem:[%s1425_s0 + $0x20] sm:$0xff]  ;;  %1130 = vmatprep.subr.msk.mxu1 %vm69_vm0, %v36_v0  ;;  %1008 = vmatprep.subr.msk.mxu0 %vm69_vm0, %v36_v0  ;;  %v29_v6 = vld [vmem:[%s1425_s0 + $0x8] sm:$0xff]  ;;  %v34_v7 = vld [vmem:[%s1425_s0 + $0x30] sm:$0xff] }
   0x3   :  { %1016 = vmatprep.mubr.msk.f32.mxu1 %vm44_vm1, %v32_v1  ;;  %1131 = vmatpush3.msk.msra.mxu1 %vm69_vm0, %v36_v0  ;;  %v28_v4 = vld [vmem:[%s1425_s0] sm:$0xff]  ;;  %v1215_v8 = vld [vmem:[%s1426_s3 + $0x10] sm:$0xff]  ;;  %v35_v9 = vld [vmem:[%s1425_s0 + $0x38] sm:$0xff] }
   0x4   :  { %1017 = vmatmul.mubr.msk.f32.vlgmr.msra.gmra.mxu1 %vm44_vm1, %v33_v2  ;;  %1022 = vmatprep.subr.mxu1 %v1134_v5  ;;  %v1227_v10 = vld [vmem:[%s1426_s3 + $0x8] sm:$0xff]  ;;  %v1236_v11 = vld [vmem:[%s1426_s3] sm:$0xff]  ;;  %v30_v13 = vld [vmem:[%s1425_s0 + $0x10] sm:$0xff] }
   0x5   :  { %1023 = vmatpush3.msra.mxu1 %v1195_v3  ;;  %1009 = vmatpush3.msk.msra.mxu0 %vm69_vm0, %v36_v0  ;;  %v182_v12 = vld [vmem:[%s1427_s1] sm:$0xff]  ;;  %v31_v14 = vld [vmem:[%s1425_s0 + $0x18] sm:$0xff]  ;;  %v787_v55 = vld [vmem:[%s1429_s5 + $0x10] sm:$0xff] }
   0x6   :  { %1010 = vmatprep.mubr.msk.f32.mxu0 %vm44_vm1, %v28_v4  ;;  %1024 = vmatprep.subr.mxu1 %v1134_v5  ;;  %v1285_v20 = vld [vmem:[%s1428_s4] ss:$0 sm:$0xff]  ;;  %v788_v49 = vld [vmem:[%s1429_s5 + $0x18] sm:$0xff]  ;;  %v786_v56 = vld [vmem:[%s1429_s5 + $0x8] sm:$0xff] }
   0x7   :  { %1011 = vmatmul.mubr.msk.f32.vlgmr.msra.gmra.mxu0 %vm44_vm1, %v29_v6  ;;  %1019 = vmatprep.mubr.msk.f32.mxu1 %vm44_vm1, %v34_v7  ;;  %v785_v57 = vld [vmem:[%s1429_s5] sm:$0xff] }
   0x8   :  { %1025 = vmatpush3.msra.mxu1 %v1215_v8  ;;  %1044 = vmatprep.subr.mxu0 %v1134_v5  ;;  %v938_v63 = vld [vmem:[%s1430_s6] ss:$0 sm:$0xff] }
   0x9   :  { %1020 = vmatmul.mubr.msk.f32.gmra.mxu1 %vm44_vm1, %v35_v9  ;;  %1026 = vmatprep.subr.mxu1 %v1134_v5 }
   0xa   :  { %1027 = vmatpush3.msra.mxu1 %v1227_v10  ;;  %1030 = vmatprep.mubr.msk.f32.mxu1 %vm1135_vm2, %v1134_v5 }
   0xb   :  { %1028 = vmatprep.subr.mxu1 %v1134_v5  ;;  %1045 = vmatpush3.msra.mxu0 %v1195_v3 }
   0xc   :  { %1029 = vmatpush3.msra.mxu1 %v1236_v11  ;;  %1046 = vmatprep.subr.mxu0 %v1134_v5 }
   0xd   :  { %1031 = vmatmul.mubr.msk.f32.vlgmr.msra.gmra.mxu1 %vm183_vm3, %v182_v12  ;;  %1033 = vmatprep.subr.mxu1 %v1134_v5 }
   0xe   :  { %1034 = vmatpush3.msra.mxu1 %v1195_v3  ;;  %1041 = vmatprep.mubr.msk.f32.mxu1 %vm1135_vm2, %v1134_v5 }
   0xf   :  { %1035 = vmatprep.subr.mxu1 %v1134_v5  ;;  %1047 = vmatpush3.msra.mxu0 %v1215_v8 }
  0x10   :  { %1036 = vmatpush3.msra.mxu1 %v1215_v8  ;;  %1048 = vmatprep.subr.mxu0 %v1134_v5 }
  0x11   :  { %1037 = vmatprep.subr.mxu1 %v1134_v5  ;;  %1049 = vmatpush3.msra.mxu0 %v1227_v10 }
  0x12   :  { %1038 = vmatpush3.msra.mxu1 %v1227_v10  ;;  %1050 = vmatprep.subr.mxu0 %v1134_v5 }
  0x13   :  { %1039 = vmatprep.subr.mxu1 %v1134_v5  ;;  %1051 = vmatpush3.msra.mxu0 %v1236_v11 }
  0x14   :  { %1040 = vmatpush3.msra.mxu1 %v1236_v11  ;;  %1066 = vmatprep.subr.mxu0 %v1134_v5 }
  0x15   :  { %1055 = vmatprep.subr.mxu1 %v1134_v5  ;;  %1013 = vmatprep.mubr.msk.f32.mxu0 %vm44_vm1, %v30_v13 }
  0x16   :  { %1014 = vmatmul.mubr.msk.f32.gmra.mxu0 %vm44_vm1, %v31_v14 }
  0x17   :  { %1052 = vmatprep.mubr.msk.f32.mxu0 %vm1135_vm2, %v1134_v5 }
  0xc4   :  { %v1276_v15 = vpop.f32.mrf.mxu1 }
  0xc5   :  { %v165_v50 = vadd.f32 %v1276_v15, %v1285_v20 }
  0xc6   :  { %v1278_v16 = vpop.f32.mrf.mxu1 }
  0xc7   :  { %v1012_v17 = vpop.f32.mrf.mxu0  ;;  %v160_v44 = vadd.f32 %v1285_v20, %v1278_v16 }
  0xc8   :  { %v145_v27 = vadd.f32 %v1012_v17, %v1285_v20 }
  0xc9   :  { %v1280_v18 = vpop.f32.mrf.mxu1  ;;  %v139_v19 = vpop.f32.mrf.mxu0 }
  0xca   :  { %v140_v22 = vadd.f32 %v1285_v20, %v139_v19  ;;  %v175_v12 = vadd.f32 %v1280_v18, %v1285_v20 }
  0xcb   :  { %v1287_v21 = vpop.f32.mrf.mxu1 }
  0xcc   :  { %v170_v58 = vadd.f32 %v1285_v20, %v1287_v21 }
  0xcd   :  { %v253_v23 = vpop.f32.mrf.mxu1 }
  0xce   :  { %v1290_v24 = vadd.f32 %v253_v23, %v140_v22 }
  0xcf   :  { %v1032_v25 = vpop.f32.mrf.mxu1 }
  0xd0   :  { %v258_v26 = vmax.f32 %v1290_v24, 0.0 }
  0xd2   :  { %1042 = vmatmul.mubr.msk.f32.vlgmr.msra.gmra.mxu1 %vm183_vm3, %v258_v26 }
  0xd3   :  { %1056 = vmatpush3.msra.mxu1 %v1195_v3  ;;  %1063 = vmatprep.mubr.msk.f32.mxu1 %vm1135_vm2, %v1134_v5 }
  0xd4   :  { %1057 = vmatprep.subr.mxu1 %v1134_v5 }
  0xd5   :  { %1058 = vmatpush3.msra.mxu1 %v1215_v8 }
  0xd6   :  { %1059 = vmatprep.subr.mxu1 %v1134_v5  ;;  %v1015_v32 = vpop.f32.mrf.mxu0 }
  0xd7   :  { %1060 = vmatpush3.msra.mxu1 %v1227_v10  ;;  %v155_v39 = vadd.f32 %v1015_v32, %v1285_v20 }
  0xd8   :  { %1061 = vmatprep.subr.mxu1 %v1134_v5  ;;  %v149_v33 = vpop.f32.mrf.mxu0 }
  0xd9   :  { %1062 = vmatpush3.msra.mxu1 %v1236_v11  ;;  %v150_v34 = vadd.f32 %v1285_v20, %v149_v33 }
  0xda   :  { %1077 = vmatprep.subr.mxu1 %v1134_v5 }
 0x192   :  { %v328_v28 = vpop.f32.mrf.mxu1 }
 0x193   :  { %v1307_v29 = vadd.f32 %v328_v28, %v145_v27 }
 0x194   :  { %v1043_v30 = vpop.f32.mrf.mxu1 }
 0x195   :  { %v333_v31 = vmax.f32 %v1307_v29, 0.0 }
 0x197   :  { %1053 = vmatmul.mubr.msk.f32.vlgmr.msra.gmra.mxu0 %vm183_vm3, %v333_v31 }
 0x198   :  { %1067 = vmatpush3.msra.mxu0 %v1195_v3  ;;  %1074 = vmatprep.mubr.msk.f32.mxu0 %vm1135_vm2, %v1134_v5 }
 0x199   :  { %1068 = vmatprep.subr.mxu0 %v1134_v5 }
 0x19a   :  { %1069 = vmatpush3.msra.mxu0 %v1215_v8 }
 0x19b   :  { %1070 = vmatprep.subr.mxu0 %v1134_v5 }
 0x19c   :  { %1071 = vmatpush3.msra.mxu0 %v1227_v10 }
 0x19d   :  { %1072 = vmatprep.subr.mxu0 %v1134_v5 }
 0x19e   :  { %1073 = vmatpush3.msra.mxu0 %v1236_v11 }
 0x19f   :  { %1088 = vmatprep.subr.mxu0 %v1134_v5 }
 0x257   :  { %v403_v35 = vpop.f32.mrf.mxu0 }
 0x258   :  { %v1324_v36 = vadd.f32 %v403_v35, %v150_v34 }
 0x259   :  { %v1054_v37 = vpop.f32.mrf.mxu0 }
 0x25a   :  { %v408_v38 = vmax.f32 %v1324_v36, 0.0 }
 0x25c   :  { %1064 = vmatmul.mubr.msk.f32.vlgmr.msra.gmra.mxu1 %vm183_vm3, %v408_v38 }
 0x25d   :  { %1078 = vmatpush3.msra.mxu1 %v1195_v3  ;;  %1085 = vmatprep.mubr.msk.f32.mxu1 %vm1135_vm2, %v1134_v5 }
 0x25e   :  { %1079 = vmatprep.subr.mxu1 %v1134_v5 }
 0x25f   :  { %1080 = vmatpush3.msra.mxu1 %v1215_v8 }
 0x260   :  { %1081 = vmatprep.subr.mxu1 %v1134_v5 }
 0x261   :  { %1082 = vmatpush3.msra.mxu1 %v1227_v10 }
 0x262   :  { %1083 = vmatprep.subr.mxu1 %v1134_v5 }
 0x263   :  { %1084 = vmatpush3.msra.mxu1 %v1236_v11 }
 0x264   :  { %1099 = vmatprep.subr.mxu1 %v1134_v5 }
 0x31c   :  { %v478_v40 = vpop.f32.mrf.mxu1 }
 0x31d   :  { %v482_v41 = vadd.f32 %v478_v40, %v155_v39 }
 0x31e   :  { %v1065_v42 = vpop.f32.mrf.mxu1 }
 0x31f   :  { %v483_v43 = vmax.f32 %v482_v41, 0.0 }
 0x321   :  { %1075 = vmatmul.mubr.msk.f32.vlgmr.msra.gmra.mxu0 %vm183_vm3, %v483_v43 }
 0x322   :  { %1089 = vmatpush3.msra.mxu0 %v1195_v3  ;;  %1096 = vmatprep.mubr.msk.f32.mxu0 %vm1135_vm2, %v1134_v5 }
 0x323   :  { %1090 = vmatprep.subr.mxu0 %v1134_v5 }
 0x324   :  { %1091 = vmatpush3.msra.mxu0 %v1215_v8 }
 0x325   :  { %1092 = vmatprep.subr.mxu0 %v1134_v5 }
 0x326   :  { %1093 = vmatpush3.msra.mxu0 %v1227_v10 }
 0x327   :  { %1094 = vmatprep.subr.mxu0 %v1134_v5 }
 0x328   :  { %1095 = vmatpush3.msra.mxu0 %v1236_v11 }
 0x329   :  { %1110 = vmatprep.subr.mxu0 %v788_v49 }
 0x3e1   :  { %v553_v45 = vpop.f32.mrf.mxu0 }
 0x3e2   :  { %v557_v46 = vadd.f32 %v553_v45, %v160_v44 }
 0x3e3   :  { %v1076_v47 = vpop.f32.mrf.mxu0 }
 0x3e4   :  { %v558_v48 = vmax.f32 %v557_v46, 0.0 }
 0x3e6   :  { %1086 = vmatmul.mubr.msk.f32.vlgmr.msra.gmra.mxu1 %vm183_vm3, %v558_v48 }
 0x3e7   :  { %1100 = vmatpush3.msra.mxu1 %v1195_v3  ;;  %1107 = vmatprep.mubr.msk.f32.mxu1 %vm1135_vm2, %v1134_v5 }
 0x3e8   :  { %1101 = vmatprep.subr.mxu1 %v1134_v5 }
 0x3e9   :  { %1102 = vmatpush3.msra.mxu1 %v1215_v8 }
 0x3ea   :  { %1103 = vmatprep.subr.mxu1 %v1134_v5 }
 0x3eb   :  { %1104 = vmatpush3.msra.mxu1 %v1227_v10 }
 0x3ec   :  { %1105 = vmatprep.subr.mxu1 %v1134_v5 }
 0x3ed   :  { %1106 = vmatpush3.msra.mxu1 %v1236_v11 }
 0x4a6   :  { %v628_v51 = vpop.f32.mrf.mxu1 }
 0x4a7   :  { %v632_v52 = vadd.f32 %v628_v51, %v165_v50 }
 0x4a8   :  { %v1087_v53 = vpop.f32.mrf.mxu1 }
 0x4a9   :  { %v633_v54 = vmax.f32 %v632_v52, 0.0 }
 0x4ab   :  { %1097 = vmatmul.mubr.msk.f32.vlgmr.msra.gmra.mxu0 %vm183_vm3, %v633_v54 }
 0x4ac   :  { %1111 = vmatpush3.msra.mxu0 %v788_v49  ;;  %1118 = vmatprep.mubr.msk.f32.mxu0 %vm183_vm3, %v258_v26 }
 0x4ad   :  { %1112 = vmatprep.subr.mxu0 %v787_v55 }
 0x4ae   :  { %1113 = vmatpush3.msra.mxu0 %v787_v55 }
 0x4af   :  { %1114 = vmatprep.subr.mxu0 %v786_v56 }
 0x4b0   :  { %1115 = vmatpush3.msra.mxu0 %v786_v56 }
 0x4b1   :  { %1116 = vmatprep.subr.mxu0 %v785_v57 }
 0x4b2   :  { %1117 = vmatpush3.msra.mxu0 %v785_v57 }
 0x4b3   :  { %1119 = vmatmul.mubr.msk.f32.vlgmr.msra.gmra.mxu0 %vm183_vm3, %v333_v31 }
 0x4b4   :  { %1121 = vmatprep.mubr.msk.f32.mxu0 %vm183_vm3, %v408_v38 }
 0x4b7   :  { %1122 = vmatmul.mubr.msk.f32.gmra.mxu0 %vm183_vm3, %v483_v43 }
 0x4b8   :  { %1124 = vmatprep.mubr.msk.f32.mxu0 %vm183_vm3, %v558_v48 }
 0x4bb   :  { %1125 = vmatmul.mubr.msk.f32.gmra.mxu0 %vm183_vm3, %v633_v54 }
 0x56b   :  { %v703_v59 = vpop.f32.mrf.mxu0 }
 0x56c   :  { %v707_v60 = vadd.f32 %v703_v59, %v170_v58 }
 0x56d   :  { %v1098_v61 = vpop.f32.mrf.mxu0 }
 0x56e   :  { %v708_v62 = vmax.f32 %v707_v60, 0.0 }
 0x570   :  { %1108 = vmatmul.mubr.msk.f32.vlgmr.msra.gmra.mxu1 %vm183_vm3, %v708_v62  ;;  %1127 = vmatprep.mubr.msk.f32.mxu0 %vm183_vm3, %v708_v62 }
 0x573   :  { %v1120_v0 = vpop.f32.mrf.mxu0 }
 0x574   :  { %v871_v1 = vadd.f32 %v1120_v0, %v938_v63 }
 0x575   :  { %v865_v2 = vpop.f32.mrf.mxu0 }
 0x576   :  { %905 = vst [vmem:[%s1431_s7 + $0x8] sm:$0xff] %v871_v1  ;;  %v866_v3 = vadd.f32 %v938_v63, %v865_v2 }
 0x577   :  { %v1123_v4 = vpop.f32.mrf.mxu0 }
 0x578   :  { %904 = vst [vmem:[%s1431_s7] sm:$0xff] %v866_v3  ;;  %v881_v5 = vadd.f32 %v1123_v4, %v938_v63 }
 0x579   :  { %v875_v6 = vpop.f32.mrf.mxu0 }
 0x57a   :  { %907 = vst [vmem:[%s1431_s7 + $0x18] sm:$0xff] %v881_v5  ;;  %v876_v7 = vadd.f32 %v938_v63, %v875_v6 }
 0x57b   :  { %v1126_v8 = vpop.f32.mrf.mxu0 }
 0x57c   :  { %906 = vst [vmem:[%s1431_s7 + $0x10] sm:$0xff] %v876_v7  ;;  %v891_v9 = vadd.f32 %v1126_v8, %v938_v63 }
 0x57d   :  { %v885_v10 = vpop.f32.mrf.mxu0 }
 0x57e   :  { %909 = vst [vmem:[%s1431_s7 + $0x28] sm:$0xff] %v891_v9  ;;  %v886_v11 = vadd.f32 %v938_v63, %v885_v10 }
 0x580   :  { %908 = vst [vmem:[%s1431_s7 + $0x20] sm:$0xff] %v886_v11 }
 0x630   :  { %v778_v13 = vpop.f32.mrf.mxu1 }
 0x631   :  { %v782_v14 = vadd.f32 %v778_v13, %v175_v12 }
 0x632   :  { %v1109_v15 = vpop.f32.mrf.mxu1 }
 0x633   :  { %v783_v16 = vmax.f32 %v782_v14, 0.0 }
 0x635   :  { %784 = vst.msk [vmem:[%s1432_s8] sm:$0xff] %vm183_vm3, %v783_v16  ;;  %1128 = vmatmul.mubr.msk.f32.gmra.mxu0 %vm183_vm3, %v783_v16 }
 0x6f5   :  { %v1129_v17 = vpop.f32.mrf.mxu0 }
 0x6f6   :  { %v901_v19 = vadd.f32 %v1129_v17, %v938_v63 }
 0x6f7   :  { %v895_v21 = vpop.f32.mrf.mxu0 }
 0x6f8   :  { %911 = vst [vmem:[%s1431_s7 + $0x38] sm:$0xff] %v901_v19  ;;  %v896_v22 = vadd.f32 %v938_v63, %v895_v21 }
 0x6fa   :  { %910 = vst [vmem:[%s1431_s7 + $0x30] sm:$0xff] %v896_v22 }

</bundles_post_ra>
